<compile_context>
chip_gen: v5e
topology: v5e:2x2
jax: 0.10.0
libtpu: 0.0.40
codegen_flags: <defaults>
</compile_context>

<pallas_src>
import jax
import jax.numpy as jnp
from jax import lax
from jax.experimental import pallas as pl
from jax.experimental.pallas import tpu as pltpu

_EPS = 1e-12  # F.normalize default eps


def _normalize_gram(g):
    """g: (bt, c, c) f32 raw Gram matrices -> doubly L2-normalized similarity.

    Equivalent to: normalize rows of x, x @ x^T, normalize rows of the result,
    but done entirely on the tiny (c, c) matrices using the Gram diagonal.
    """
    bt, c, _ = g.shape
    row_idx = lax.broadcasted_iota(jnp.int32, (bt, c, c), 1)
    col_idx = lax.broadcasted_iota(jnp.int32, (bt, c, c), 2)
    masked = jnp.where(row_idx == col_idx, g, 0.0)
    d_row = jnp.sum(masked, axis=2, keepdims=True)   # (bt, c, 1)  = ||x_i||^2
    d_col = jnp.sum(masked, axis=1, keepdims=True)   # (bt, 1, c)  (same diag, row layout)
    inv_row = 1.0 / jnp.maximum(jnp.sqrt(jnp.maximum(d_row, 0.0)), _EPS)
    inv_col = 1.0 / jnp.maximum(jnp.sqrt(jnp.maximum(d_col, 0.0)), _EPS)
    sim = g * inv_row * inv_col                       # == normalize(x) @ normalize(x)^T
    row_norm = jnp.sqrt(jnp.sum(sim * sim, axis=2, keepdims=True))
    return sim / jnp.maximum(row_norm, _EPS)


def _loss_distill_kernel(s_ref, t_ref, o_ref, gs_ref, gt_ref):
    # s_ref / t_ref: (bt, c, tk) blocks (original dtype).
    # o_ref:         (1, 1, 1) per-batch-tile partial sum of squared differences.
    # gs_ref/gt_ref: (bt, c, c) f32 Gram accumulators, resident across the N axis.
    k = pl.program_id(1)

    @pl.when(k == 0)
    def _():
        gs_ref[...] = jnp.zeros_like(gs_ref)
        gt_ref[...] = jnp.zeros_like(gt_ref)

    s = s_ref[...]
    t = t_ref[...]
    # Batched Gram chunk on the MXU, f32 accumulation (bf16 inputs supported).
    gs_ref[...] += jnp.einsum("bcn,bdn->bcd", s, s,
                              preferred_element_type=jnp.float32)
    gt_ref[...] += jnp.einsum("bcn,bdn->bcd", t, t,
                              preferred_element_type=jnp.float32)

    @pl.when(k == pl.num_programs(1) - 1)
    def _():
        diff = _normalize_gram(gs_ref[...]) - _normalize_gram(gt_ref[...])  # (bt, c, c)
        sq = diff * diff
        acc2d = jnp.sum(sq, axis=0)                   # (c, c)  reduce batch-tile dim
        o_ref[0] = jnp.sum(acc2d, keepdims=True)      # (1, 1) partial sum


def _pick_tiles(b, c, n, itemsize, max_tk, input_tile_bytes):
    """Choose (bt, tk): tk a multiple of 128 dividing N (or full N); bt divides b."""
    tk = n
    if n % 128 == 0 and n > max_tk:
        for cand in range(max_tk, 0, -128):
            if n % cand == 0:
                tk = cand
                break
    bt = 1
    for cand in range(b, 0, -1):
        if b % cand == 0 and cand * c * tk * itemsize <= input_tile_bytes:
            bt = cand
            break
    return bt, tk


def loss_distill(student_feature, teacher_feature, *,
                 max_tk=2048, input_tile_bytes=3 << 20):
    """student_feature, teacher_feature: NCHW arrays of identical shape."""
    assert student_feature.shape == teacher_feature.shape
    b, c = student_feature.shape[:2]
    # Keep the original dtype through the DMA (no f32 upcast in the wrapper).
    s = student_feature.reshape(b, c, -1)
    t = teacher_feature.reshape(b, c, -1)
    n = s.shape[-1]

    bt, tk = _pick_tiles(b, c, n, s.dtype.itemsize, max_tk, input_tile_bytes)
    nb = b // bt
    kt = n // tk

    out = pl.pallas_call(
        _loss_distill_kernel,
        out_shape=jax.ShapeDtypeStruct((nb, 1, 1), jnp.float32),
        grid_spec=pltpu.PrefetchScalarGridSpec(
            num_scalar_prefetch=0,
            grid=(nb, kt),
            in_specs=[
                pl.BlockSpec((bt, c, tk), lambda i, k: (i, 0, k)),
                pl.BlockSpec((bt, c, tk), lambda i, k: (i, 0, k)),
            ],
            out_specs=pl.BlockSpec((1, 1, 1), lambda i, k: (i, 0, 0)),
            scratch_shapes=[
                pltpu.VMEM((bt, c, c), jnp.float32),
                pltpu.VMEM((bt, c, c), jnp.float32),
            ],
        ),
        compiler_params=pltpu.CompilerParams(
            # batch-tile axis is independent (megacore-shardable); N axis carries
            # the Gram accumulators.
            dimension_semantics=("parallel", "arbitrary"),
            vmem_limit_bytes=32 * 1024 * 1024,
        ),
    )(s, t)

    # Cross-tile sum + Frobenius sqrt in the wrapper (keeps per-tile partials
    # independent; single scalar ops are free in XLA).
    return jnp.sqrt(jnp.sum(out))


def _reference_loss(student_feature, teacher_feature):
    """Pure-JAX reference mirroring the PyTorch forward."""
    def sim(f):
        b, c = f.shape[:2]
        ff = f.reshape(b, c, -1).astype(jnp.float32)
        ff = ff / jnp.maximum(
            jnp.sqrt(jnp.sum(ff * ff, axis=2, keepdims=True)), _EPS
        )
        m = jnp.einsum("bcn,bdn->bcd", ff, ff)
        m = m / jnp.maximum(
            jnp.sqrt(jnp.sum(m * m, axis=2, keepdims=True)), _EPS
        )
        return m

    d = sim(student_feature) - sim(teacher_feature)
    return jnp.sqrt(jnp.sum(d * d))


if __name__ == "__main__":
    key = jax.random.PRNGKey(0)
    k_s, k_t = jax.random.split(key)

    # Small NCHW feature maps: batch=2, channels=4, spatial=16x16.
    student = jax.random.normal(k_s, (2, 4, 16, 16), dtype=jnp.float32)
    teacher = jax.random.normal(k_t, (2, 4, 16, 16), dtype=jnp.float32)

    ref = jax.block_until_ready(_reference_loss(student, teacher))

    # Default tiling: whole batch + full N in one grid step for this tiny shape.
    loss = jax.block_until_ready(loss_distill(student, teacher))
    assert jnp.allclose(loss, ref, rtol=1e-5, atol=1e-5), (loss, ref)

    # Exercise the general tiled paths (N-chunked contraction, kt=2, and
    # per-batch-tile partial outputs, nb=2) against the same reference.
    loss_tiled = jax.block_until_ready(
        loss_distill(student, teacher, max_tk=128, input_tile_bytes=4 * 128 * 4)
    )
    assert jnp.allclose(loss_tiled, ref, rtol=1e-5, atol=1e-5), (loss_tiled, ref)

    print("KERNEL_OK")
</pallas_src>

<mosaic_0001>
module attributes {stable_mosaic.version = 11 : i64} {
  func.func @_loss_distill_kernel(%arg0: i32, %arg1: i32, %arg2: memref<2x4x256xf32, #tpu.memory_space<vmem>>, %arg3: memref<2x4x256xf32, #tpu.memory_space<vmem>>, %arg4: memref<1x1x1xf32, #tpu.memory_space<vmem>>, %arg5: memref<2x4x4xf32, #tpu.memory_space<vmem>>, %arg6: memref<2x4x4xf32, #tpu.memory_space<vmem>>) attributes {dimension_semantics = [#tpu.dimension_semantics<parallel>, #tpu.dimension_semantics<arbitrary>], iteration_bounds = array<i64: 1, 1>, scalar_prefetch = 0 : i64, scratch_operands = 2 : i64, tpu.core_type = #tpu.core_type<tc>, window_params = [{transform_indices = @transform_0, window_bounds = array<i64: 2, 4, 256>}, {transform_indices = @transform_1, window_bounds = array<i64: 2, 4, 256>}, {transform_indices = @transform_2, window_bounds = array<i64: 1, 1, 1>}]} {
    %c0_i32 = arith.constant 0 : i32
    %0 = arith.cmpi eq, %arg1, %c0_i32 : i32
    %1 = arith.extui %0 : i1 to i32
    %c0_i32_0 = arith.constant 0 : i32
    %2 = arith.cmpi ne, %1, %c0_i32_0 : i32
    scf.if %2 {
      %cst_21 = arith.constant 0.000000e+00 : f32
      %16 = vector.broadcast %cst_21 : f32 to vector<2x4x4xf32>
      %c0_22 = arith.constant 0 : index
      %c0_23 = arith.constant 0 : index
      %c0_24 = arith.constant 0 : index
      %17 = vector.load %arg5[%c0_22, %c0_23, %c0_24] : memref<2x4x4xf32, #tpu.memory_space<vmem>>, vector<2x4x4xf32>
      tpu.vector_store %arg5[%c0_22, %c0_23, %c0_24], %16 {strides = array<i32>} : memref<2x4x4xf32, #tpu.memory_space<vmem>>, vector<2x4x4xf32>,
      %cst_25 = arith.constant 0.000000e+00 : f32
      %18 = vector.broadcast %cst_25 : f32 to vector<2x4x4xf32>
      %c0_26 = arith.constant 0 : index
      %c0_27 = arith.constant 0 : index
      %c0_28 = arith.constant 0 : index
      %19 = vector.load %arg6[%c0_26, %c0_27, %c0_28] : memref<2x4x4xf32, #tpu.memory_space<vmem>>, vector<2x4x4xf32>
      tpu.vector_store %arg6[%c0_26, %c0_27, %c0_28], %18 {strides = array<i32>} : memref<2x4x4xf32, #tpu.memory_space<vmem>>, vector<2x4x4xf32>,
    } else {
    }
    %c0 = arith.constant 0 : index
    %c0_1 = arith.constant 0 : index
    %c0_2 = arith.constant 0 : index
    %3 = vector.load %arg2[%c0, %c0_1, %c0_2] : memref<2x4x256xf32, #tpu.memory_space<vmem>>, vector<2x4x256xf32>
    %c0_3 = arith.constant 0 : index
    %c0_4 = arith.constant 0 : index
    %c0_5 = arith.constant 0 : index
    %4 = vector.load %arg3[%c0_3, %c0_4, %c0_5] : memref<2x4x256xf32, #tpu.memory_space<vmem>>, vector<2x4x256xf32>
    %c0_6 = arith.constant 0 : index
    %c0_7 = arith.constant 0 : index
    %c0_8 = arith.constant 0 : index
    %5 = vector.load %arg5[%c0_6, %c0_7, %c0_8] : memref<2x4x4xf32, #tpu.memory_space<vmem>>, vector<2x4x4xf32>
    "tpu.trace_start"() <{level = 10 : i32, message = "bcn,bdn->bcd"}> : () -> ()
    %cst = arith.constant dense<0.000000e+00> : vector<2x4x4xf32>
    %6 = tpu.matmul %3, %3, %cst {dimension_numbers = #tpu.dot_dimension_numbers<[2], [2], [1], [1], [0, 0, 0, 1, 1, 1], [0], [0]>} : vector<2x4x256xf32>, vector<2x4x256xf32>, vector<2x4x4xf32> -> vector<2x4x4xf32>
    "tpu.trace_stop"() : () -> ()
    %7 = arith.addf %5, %6 : vector<2x4x4xf32>
    %c0_9 = arith.constant 0 : index
    %c0_10 = arith.constant 0 : index
    %c0_11 = arith.constant 0 : index
    %8 = vector.load %arg5[%c0_9, %c0_10, %c0_11] : memref<2x4x4xf32, #tpu.memory_space<vmem>>, vector<2x4x4xf32>
    tpu.vector_store %arg5[%c0_9, %c0_10, %c0_11], %7 {strides = array<i32>} : memref<2x4x4xf32, #tpu.memory_space<vmem>>, vector<2x4x4xf32>,
    %c0_12 = arith.constant 0 : index
    %c0_13 = arith.constant 0 : index
    %c0_14 = arith.constant 0 : index
    %9 = vector.load %arg6[%c0_12, %c0_13, %c0_14] : memref<2x4x4xf32, #tpu.memory_space<vmem>>, vector<2x4x4xf32>
    "tpu.trace_start"() <{level = 10 : i32, message = "bcn,bdn->bcd"}> : () -> ()
    %cst_15 = arith.constant dense<0.000000e+00> : vector<2x4x4xf32>
    %10 = tpu.matmul %4, %4, %cst_15 {dimension_numbers = #tpu.dot_dimension_numbers<[2], [2], [1], [1], [0, 0, 0, 1, 1, 1], [0], [0]>} : vector<2x4x256xf32>, vector<2x4x256xf32>, vector<2x4x4xf32> -> vector<2x4x4xf32>
    "tpu.trace_stop"() : () -> ()
    %11 = arith.addf %9, %10 : vector<2x4x4xf32>
    %c0_16 = arith.constant 0 : index
    %c0_17 = arith.constant 0 : index
    %c0_18 = arith.constant 0 : index
    %12 = vector.load %arg6[%c0_16, %c0_17, %c0_18] : memref<2x4x4xf32, #tpu.memory_space<vmem>>, vector<2x4x4xf32>
    tpu.vector_store %arg6[%c0_16, %c0_17, %c0_18], %11 {strides = array<i32>} : memref<2x4x4xf32, #tpu.memory_space<vmem>>, vector<2x4x4xf32>,
    %c0_i32_19 = arith.constant 0 : i32
    %13 = arith.cmpi eq, %arg1, %c0_i32_19 : i32
    %14 = arith.extui %13 : i1 to i32
    %c0_i32_20 = arith.constant 0 : i32
    %15 = arith.cmpi ne, %14, %c0_i32_20 : i32
    scf.if %15 {
      %c0_21 = arith.constant 0 : index
      %c0_22 = arith.constant 0 : index
      %c0_23 = arith.constant 0 : index
      %16 = vector.load %arg5[%c0_21, %c0_22, %c0_23] : memref<2x4x4xf32, #tpu.memory_space<vmem>>, vector<2x4x4xf32>
      %17 = tpu.iota {dimensions = array<i32: 1>} : vector<2x4x4xi32>
      %18 = tpu.iota {dimensions = array<i32: 2>} : vector<2x4x4xi32>
      %19 = arith.cmpi eq, %17, %18 : vector<2x4x4xi32>
      %cst_24 = arith.constant 0.000000e+00 : f32
      %20 = vector.broadcast %cst_24 : f32 to vector<2x4x4xf32>
      %21 = arith.select %19, %16, %20 : vector<2x4x4xi1>, vector<2x4x4xf32>
      %cst_25 = arith.constant dense<0.000000e+00> : vector<2x4xf32>
      %22 = vector.multi_reduction <add>, %21, %cst_25 [2] : vector<2x4x4xf32> to vector<2x4xf32>
      %23 = vector.shape_cast %22 : vector<2x4xf32> to vector<2x4x1xf32>
      %cst_26 = arith.constant dense<0.000000e+00> : vector<2x4xf32>
      %24 = vector.multi_reduction <add>, %21, %cst_26 [1] : vector<2x4x4xf32> to vector<2x4xf32>
      %25 = vector.shape_cast %24 : vector<2x4xf32> to vector<2x1x4xf32>
      %cst_27 = arith.constant 0.000000e+00 : f32
      %26 = vector.broadcast %cst_27 : f32 to vector<2x4x1xf32>
      %27 = arith.maximumf %23, %26 : vector<2x4x1xf32>
      %28 = math.sqrt %27 : vector<2x4x1xf32>
      %cst_28 = arith.constant 9.99999996E-13 : f32
      %29 = vector.broadcast %cst_28 : f32 to vector<2x4x1xf32>
      %30 = arith.maximumf %28, %29 : vector<2x4x1xf32>
      %cst_29 = arith.constant 1.000000e+00 : f32
      %31 = vector.broadcast %cst_29 : f32 to vector<2x4x1xf32>
      %32 = arith.divf %31, %30 : vector<2x4x1xf32>
      %cst_30 = arith.constant 0.000000e+00 : f32
      %33 = vector.broadcast %cst_30 : f32 to vector<2x1x4xf32>
      %34 = arith.maximumf %25, %33 : vector<2x1x4xf32>
      %35 = math.sqrt %34 : vector<2x1x4xf32>
      %cst_31 = arith.constant 9.99999996E-13 : f32
      %36 = vector.broadcast %cst_31 : f32 to vector<2x1x4xf32>
      %37 = arith.maximumf %35, %36 : vector<2x1x4xf32>
      %cst_32 = arith.constant 1.000000e+00 : f32
      %38 = vector.broadcast %cst_32 : f32 to vector<2x1x4xf32>
      %39 = arith.divf %38, %37 : vector<2x1x4xf32>
      %40 = vector.broadcast %32 : vector<2x4x1xf32> to vector<2x4x4xf32>
      %41 = arith.mulf %16, %40 : vector<2x4x4xf32>
      %42 = vector.broadcast %39 : vector<2x1x4xf32> to vector<2x4x4xf32>
      %43 = arith.mulf %41, %42 : vector<2x4x4xf32>
      %44 = arith.mulf %43, %43 : vector<2x4x4xf32>
      %cst_33 = arith.constant dense<0.000000e+00> : vector<2x4xf32>
      %45 = vector.multi_reduction <add>, %44, %cst_33 [2] : vector<2x4x4xf32> to vector<2x4xf32>
      %46 = vector.shape_cast %45 : vector<2x4xf32> to vector<2x4x1xf32>
      %47 = math.sqrt %46 : vector<2x4x1xf32>
      %cst_34 = arith.constant 9.99999996E-13 : f32
      %48 = vector.broadcast %cst_34 : f32 to vector<2x4x1xf32>
      %49 = arith.maximumf %47, %48 : vector<2x4x1xf32>
      %50 = vector.broadcast %49 : vector<2x4x1xf32> to vector<2x4x4xf32>
      %51 = arith.divf %43, %50 : vector<2x4x4xf32>
      %c0_35 = arith.constant 0 : index
      %c0_36 = arith.constant 0 : index
      %c0_37 = arith.constant 0 : index
      %52 = vector.load %arg6[%c0_35, %c0_36, %c0_37] : memref<2x4x4xf32, #tpu.memory_space<vmem>>, vector<2x4x4xf32>
      %53 = tpu.iota {dimensions = array<i32: 1>} : vector<2x4x4xi32>
      %54 = tpu.iota {dimensions = array<i32: 2>} : vector<2x4x4xi32>
      %55 = arith.cmpi eq, %53, %54 : vector<2x4x4xi32>
      %cst_38 = arith.constant 0.000000e+00 : f32
      %56 = vector.broadcast %cst_38 : f32 to vector<2x4x4xf32>
      %57 = arith.select %55, %52, %56 : vector<2x4x4xi1>, vector<2x4x4xf32>
      %cst_39 = arith.constant dense<0.000000e+00> : vector<2x4xf32>
      %58 = vector.multi_reduction <add>, %57, %cst_39 [2] : vector<2x4x4xf32> to vector<2x4xf32>
      %59 = vector.shape_cast %58 : vector<2x4xf32> to vector<2x4x1xf32>
      %cst_40 = arith.constant dense<0.000000e+00> : vector<2x4xf32>
      %60 = vector.multi_reduction <add>, %57, %cst_40 [1] : vector<2x4x4xf32> to vector<2x4xf32>
      %61 = vector.shape_cast %60 : vector<2x4xf32> to vector<2x1x4xf32>
      %cst_41 = arith.constant 0.000000e+00 : f32
      %62 = vector.broadcast %cst_41 : f32 to vector<2x4x1xf32>
      %63 = arith.maximumf %59, %62 : vector<2x4x1xf32>
      %64 = math.sqrt %63 : vector<2x4x1xf32>
      %cst_42 = arith.constant 9.99999996E-13 : f32
      %65 = vector.broadcast %cst_42 : f32 to vector<2x4x1xf32>
      %66 = arith.maximumf %64, %65 : vector<2x4x1xf32>
      %cst_43 = arith.constant 1.000000e+00 : f32
      %67 = vector.broadcast %cst_43 : f32 to vector<2x4x1xf32>
      %68 = arith.divf %67, %66 : vector<2x4x1xf32>
      %cst_44 = arith.constant 0.000000e+00 : f32
      %69 = vector.broadcast %cst_44 : f32 to vector<2x1x4xf32>
      %70 = arith.maximumf %61, %69 : vector<2x1x4xf32>
      %71 = math.sqrt %70 : vector<2x1x4xf32>
      %cst_45 = arith.constant 9.99999996E-13 : f32
      %72 = vector.broadcast %cst_45 : f32 to vector<2x1x4xf32>
      %73 = arith.maximumf %71, %72 : vector<2x1x4xf32>
      %cst_46 = arith.constant 1.000000e+00 : f32
      %74 = vector.broadcast %cst_46 : f32 to vector<2x1x4xf32>
      %75 = arith.divf %74, %73 : vector<2x1x4xf32>
      %76 = vector.broadcast %68 : vector<2x4x1xf32> to vector<2x4x4xf32>
      %77 = arith.mulf %52, %76 : vector<2x4x4xf32>
      %78 = vector.broadcast %75 : vector<2x1x4xf32> to vector<2x4x4xf32>
      %79 = arith.mulf %77, %78 : vector<2x4x4xf32>
      %80 = arith.mulf %79, %79 : vector<2x4x4xf32>
      %cst_47 = arith.constant dense<0.000000e+00> : vector<2x4xf32>
      %81 = vector.multi_reduction <add>, %80, %cst_47 [2] : vector<2x4x4xf32> to vector<2x4xf32>
      %82 = vector.shape_cast %81 : vector<2x4xf32> to vector<2x4x1xf32>
      %83 = math.sqrt %82 : vector<2x4x1xf32>
      %cst_48 = arith.constant 9.99999996E-13 : f32
      %84 = vector.broadcast %cst_48 : f32 to vector<2x4x1xf32>
      %85 = arith.maximumf %83, %84 : vector<2x4x1xf32>
      %86 = vector.broadcast %85 : vector<2x4x1xf32> to vector<2x4x4xf32>
      %87 = arith.divf %79, %86 : vector<2x4x4xf32>
      %88 = arith.subf %51, %87 : vector<2x4x4xf32>
      %89 = arith.mulf %88, %88 : vector<2x4x4xf32>
      %cst_49 = arith.constant dense<0.000000e+00> : vector<4x4xf32>
      %90 = vector.multi_reduction <add>, %89, %cst_49 [0] : vector<2x4x4xf32> to vector<4x4xf32>
      %91 = vector.shape_cast %90 : vector<4x4xf32> to vector<1x4x4xf32>
      %cst_50 = arith.constant dense<0.000000e+00> : vector<1xf32>
      %92 = vector.multi_reduction <add>, %91, %cst_50 [1, 2] : vector<1x4x4xf32> to vector<1xf32>
      %93 = vector.shape_cast %92 : vector<1xf32> to vector<1x1x1xf32>
      %94 = vector.extract %93[0, 0, 0] : f32 from vector<1x1x1xf32>
      %95 = vector.broadcast %94 : f32 to vector<1x1xf32>
      %c0_51 = arith.constant 0 : index
      %c0_52 = arith.constant 0 : index
      %c0_53 = arith.constant 0 : index
      %96 = vector.load %arg4[%c0_51, %c0_52, %c0_53] : memref<1x1x1xf32, #tpu.memory_space<vmem>>, vector<1x1x1xf32>
      %97 = vector.shape_cast %96 : vector<1x1x1xf32> to vector<1x1xf32>
      %98 = vector.shape_cast %95 : vector<1x1xf32> to vector<1x1x1xf32>
      tpu.vector_store %arg4[%c0_51, %c0_52, %c0_53], %98 {strides = array<i32>} : memref<1x1x1xf32, #tpu.memory_space<vmem>>, vector<1x1x1xf32>,
    } else {
    }
    return
  }
  func.func @transform_0(%arg0: i32, %arg1: i32) -> (i32, i32, i32) {
    %c0_i32 = arith.constant 0 : i32
    %c0_i32_0 = arith.constant 0 : i32
    return %arg0, %c0_i32, %arg1 : i32, i32, i32
  }
  func.func @transform_1(%arg0: i32, %arg1: i32) -> (i32, i32, i32) {
    %c0_i32 = arith.constant 0 : i32
    %c0_i32_0 = arith.constant 0 : i32
    return %arg0, %c0_i32, %arg1 : i32, i32, i32
  }
  func.func @transform_2(%arg0: i32, %arg1: i32) -> (i32, i32, i32) {
    %c0_i32 = arith.constant 0 : i32
    %c0_i32_0 = arith.constant 0 : i32
    %c0_i32_1 = arith.constant 0 : i32
    return %arg0, %c0_i32, %c0_i32_0 : i32, i32, i32
  }
}

</mosaic_0001>

<bundles_post_ra>
// kernel: tpu_custom_call.1
= control target key start
LH: loop header
LB: loop body
LE: loop exit
PB: predicated region body
PF: predicated region fallthrough
CT: control target
= control target key end

     0   :  { %7 = vsyncpa [#allocation5], 0  ;;  %s1131_s0 = inlined_call_operand.hbm [shape: f32[2,4,256], index: 0, kind: input, shape index: {}]   ;;  %s1132_s1 = inlined_call_operand.hbm [shape: f32[2,4,256], index: 1, kind: input, shape index: {}]   ;;  %s1133_s2 = inlined_call_operand.hbm [shape: f32[1,1,1], index: 2, kind: output, shape index: {}]  }
   0x1   :  { %8 = vsyncpa [#allocation8], 0 }
   0x2   :  { %9 = vsyncpa [#allocation6], 0  ;;  %s14_s11 = sshll.u32 %s1131_s0, 4  ;;  %s866_s12 = smov [#allocation4]   ;;  %s15_s11 = int_to_ptr.hbm [resolvable:$true] %s14_s11 }
   0x3   :  { %s16_s13 = sshll.u32 %s866_s12, 4  ;;  %s27_s16 = sshll.u32 %s1132_s1, 4  ;;  %s17_s13 = int_to_ptr.vmem [resolvable:$true] %s16_s13  ;;  %s28_s16 = int_to_ptr.hbm [resolvable:$true] %s27_s16 }
   0x4   :  { %s867_s17 = smov 128   ;;  %s868_s18 = smov 8  }
   0x5   :  { %22 = dma.hbm_to_vmem [thread:$0]  %s15_s11, 256, %s17_s13, [#allocation5], %s867_s17, %s867_s17, %s868_s18  }
   0x6   :  { %s869_s19 = smov [#allocation7]  }
   0x7   :  { %s29_s20 = sshll.u32 %s869_s19, 4  ;;  %s30_s20 = int_to_ptr.vmem [resolvable:$true] %s29_s20 }
   0x8   :  { %35 = dma.hbm_to_vmem [thread:$0]  %s28_s16, 256, %s30_s20, [#allocation8], %s867_s17, %s867_s17, %s868_s18  }
   0x9   :  { %860 = dma.done.wait [#allocation5], 256  }
   0xa   :  { %861 = vsyncadd [#allocation5], 4294967040 }
   0xb   :  { %862 = dma.done.wait [#allocation8], 256  }
   0xc   :  { %863 = vsyncadd [#allocation8], 4294967040  ;;  %v53_v0 = vld [vmem:[#allocation4] sm:$0xff]  ;;  %v54_v3 = vld [vmem:[#allocation4 + $0x8] sm:$0xff]  ;;  %vm48_vm0 = vcmask 27648   ;;  %v870_v20 = vmov 0.0   ;;  %v279_v25 = vlaneseq }
   0xd   :  { %60 = vst [vmem:[#allocation1] ss:$2 sm:$0xff] %v53_v0  ;;  %v55_v8 = vld [vmem:[#allocation7] sm:$0xff]  ;;  %v56_v13 = vld [vmem:[#allocation7 + $0x8] sm:$0xff]  ;;  %s721_s21 = sshll.u32 %s1133_s2, 4  ;;  %s871_s22 = smov [#allocation9]   ;;  %s722_s21 = int_to_ptr.hbm [resolvable:$true] %s721_s21 }
   0xe   :  { %49 = vst.msk [vmem:[#allocation2] sm:$0xf] %vm48_vm0, %v870_v20  ;;  %v280_v27 = vshrl.u32 %v279_v25, 7  ;;  %v282_v28 = vand.u32 127, %v279_v25  ;;  %s719_s23 = sshll.u32 %s871_s22, 4  ;;  %s720_s23 = int_to_ptr.vmem [resolvable:$true] %s719_s23 }
   0xf   :  { %50 = vst.msk [vmem:[#allocation2 + $0x4] sm:$0xf] %vm48_vm0, %v870_v20 }
  0x10   :  { %51 = vst.msk [vmem:[#allocation3] sm:$0xf] %vm48_vm0, %v870_v20  ;;  %vm283_vm1 = vcmp.eq.s32.totalorder %v280_v27, %v282_v28 }
  0x11   :  { %52 = vst.msk [vmem:[#allocation3 + $0x4] sm:$0xf] %vm48_vm0, %v870_v20 }
  0x14   :  { %v61_v1 = vld.sshfl [vmem:[#allocation1] sm:$0xff pattern:$0x75316420]  ;;  %v62_v2 = vld.sshfl [vmem:[#allocation1 + $0x8] sm:$0xff pattern:$0x75316420] }
  0x15   :  { %65 = vst [vmem:[#allocation1] ss:$2 sm:$0xff] %v53_v0  ;;  %v57_v22 = vld [vmem:[#allocation2] sm:$0xf] }
  0x16   :  { %v58_v33 = vld [vmem:[#allocation2 + $0x4] sm:$0xf] }
  0x17   :  { %v166_v38 = vld [vmem:[#allocation3] sm:$0xf] }
  0x18   :  { %v167_v49 = vld [vmem:[#allocation3 + $0x4] sm:$0xf] }
  0x1c   :  { %v66_v4 = vld.sshfl [vmem:[#allocation1] sm:$0xff pattern:$0x75316420]  ;;  %v67_v5 = vld.sshfl [vmem:[#allocation1 + $0x8] sm:$0xff pattern:$0x75316420] }
  0x1d   :  { %85 = vmatpush.xpose.msra.mxu0 %v66_v4  ;;  %105 = vmatpush.xpose.msra.mxu1 %v67_v5  ;;  %111 = vst [vmem:[#allocation1] ss:$2 sm:$0xff] %v54_v3 }
  0x20   :  { %86 = vmatmul.f32.vlgmr.msra.gmra.mxu0 %v61_v1  ;;  %106 = vmatmul.f32.vlgmr.msra.gmra.mxu1 %v62_v2 }
  0x24   :  { %v112_v6 = vld.sshfl [vmem:[#allocation1] sm:$0xff pattern:$0x75316420]  ;;  %v113_v7 = vld.sshfl [vmem:[#allocation1 + $0x8] sm:$0xff pattern:$0x75316420] }
  0x25   :  { %116 = vst [vmem:[#allocation1] ss:$2 sm:$0xff] %v54_v3 }
  0x2c   :  { %v117_v9 = vld.sshfl [vmem:[#allocation1] sm:$0xff pattern:$0x75316420]  ;;  %v118_v10 = vld.sshfl [vmem:[#allocation1 + $0x8] sm:$0xff pattern:$0x75316420] }
  0x2d   :  { %136 = vmatpush.xpose.msra.mxu2 %v117_v9  ;;  %156 = vmatpush.xpose.msra.mxu3 %v118_v10  ;;  %169 = vst [vmem:[#allocation1] ss:$2 sm:$0xff] %v55_v8 }
  0x30   :  { %137 = vmatmul.f32.vlgmr.msra.gmra.mxu2 %v112_v6  ;;  %157 = vmatmul.f32.vlgmr.msra.gmra.mxu3 %v113_v7 }
  0x34   :  { %v170_v11 = vld.sshfl [vmem:[#allocation1] sm:$0xff pattern:$0x75316420]  ;;  %v171_v12 = vld.sshfl [vmem:[#allocation1 + $0x8] sm:$0xff pattern:$0x75316420] }
  0x35   :  { %174 = vst [vmem:[#allocation1] ss:$2 sm:$0xff] %v55_v8 }
  0x3c   :  { %v175_v14 = vld.sshfl [vmem:[#allocation1] sm:$0xff pattern:$0x75316420]  ;;  %v176_v15 = vld.sshfl [vmem:[#allocation1 + $0x8] sm:$0xff pattern:$0x75316420] }
  0x3d   :  { %194 = vmatpush.xpose.msrb.mxu0 %v175_v14  ;;  %214 = vmatpush.xpose.msrb.mxu1 %v176_v15  ;;  %220 = vst [vmem:[#allocation1] ss:$2 sm:$0xff] %v56_v13 }
  0x40   :  { %195 = vmatmul.f32.vlgmr.msrb.gmra.mxu0 %v170_v11  ;;  %215 = vmatmul.f32.vlgmr.msrb.gmra.mxu1 %v171_v12 }
  0x44   :  { %v221_v16 = vld.sshfl [vmem:[#allocation1] sm:$0xff pattern:$0x75316420]  ;;  %v222_v17 = vld.sshfl [vmem:[#allocation1 + $0x8] sm:$0xff pattern:$0x75316420] }
  0x45   :  { %225 = vst [vmem:[#allocation1] ss:$2 sm:$0xff] %v56_v13 }
  0x4c   :  { %v226_v18 = vld.sshfl [vmem:[#allocation1] sm:$0xff pattern:$0x75316420]  ;;  %v227_v19 = vld.sshfl [vmem:[#allocation1 + $0x8] sm:$0xff pattern:$0x75316420] }
  0x4d   :  { %245 = vmatpush.xpose.msrb.mxu2 %v226_v18  ;;  %265 = vmatpush.xpose.msrb.mxu3 %v227_v19 }
  0x50   :  { %246 = vmatmul.f32.vlgmr.msrb.gmra.mxu2 %v221_v16  ;;  %266 = vmatmul.f32.vlgmr.msrb.gmra.mxu3 %v222_v17 }
  0x9d   :  { %v87_v21 = vpop.f32.mrf.mxu0  ;;  %v107_v23 = vpop.f32.mrf.mxu1 }
  0x9e   :  { %v108_v24 = vadd.f32 %v107_v23, %v87_v21 }
  0xa0   :  { %v161_v26 = vadd.f32 %v108_v24, %v57_v22 }
  0xa2   :  { %164 = vst.msk [vmem:[#allocation2] sm:$0xf] %vm48_vm0, %v161_v26 }
  0xa9   :  { %v898_v29 = vld [vmem:[#allocation2] sm:$0xf] }
  0xaa   :  { %v284_v30 = vsel %vm283_vm1, %v898_v29, 0.0 }
  0xab   :  { %v286_v31 = vsel %vm48_vm0, %v284_v30, 0.0 }
  0xac   :  { %287 = vadd.xlane.f32.xlu0 %v286_v31  ;;  %v292_v56 = vrot.slane %v286_v31, 4 }
  0xae   :  { %v293_v57 = vadd.f32 %v292_v56, %v286_v31 }
  0xb0   :  { %v294_v58 = vrot.slane %v293_v57, 2 }
  0xb2   :  { %v295_v59 = vadd.f32 %v294_v58, %v293_v57 }
  0xb3   :  { %v138_v32 = vpop.f32.mrf.mxu2  ;;  %v158_v34 = vpop.f32.mrf.mxu3 }
  0xb4   :  { %v159_v35 = vadd.f32 %v158_v34, %v138_v32  ;;  %v296_v60 = vrot.slane %v295_v59, 1 }
  0xb6   :  { %v162_v36 = vadd.f32 %v159_v35, %v58_v33  ;;  %v297_v61 = vadd.f32 %v296_v60, %v295_v59 }
  0xb8   :  { %165 = vst.msk [vmem:[#allocation2 + $0x4] sm:$0xf] %vm48_vm0, %v162_v36  ;;  %v362_v63 = vmax.f32 %v297_v61, 0.0 }
  0xba   :  { %740 = vrsqrt.f32 %v362_v63  ;;  %vm371_vm2 = vcmp.eq.f32.partialorder %v362_v63, inf  ;;  %v374_v27 = vand.u32 2147483648, %v362_v63  ;;  %vm373_vm3 = vcmp.eq.f32.partialorder %v362_v63, 0.0 }
  0xbd   :  { %v196_v37 = vpop.f32.mrf.mxu0  ;;  %v216_v39 = vpop.f32.mrf.mxu1 }
  0xbe   :  { %v217_v40 = vadd.f32 %v216_v39, %v196_v37 }
  0xbf   :  { %v904_v41 = vld [vmem:[#allocation2 + $0x4] sm:$0xf] }
  0xc0   :  { %v270_v42 = vadd.f32 %v217_v40, %v166_v38  ;;  %v285_v43 = vsel %vm283_vm1, %v904_v41, 0.0  ;;  %v741_v4 = vpop.eup %740 }
  0xc1   :  { %v289_v44 = vsel %vm48_vm0, %v285_v43, 0.0  ;;  %v365_v7 = vmul.f32 %v741_v4, %v362_v63 }
  0xc2   :  { %272 = vst.msk [vmem:[#allocation3] sm:$0xf] %vm48_vm0, %v270_v42  ;;  %290 = vadd.xlane.f32.xlu0 %v289_v44  ;;  %v298_v62 = vrot.slane %v289_v44, 4 }
  0xc3   :  { %v366_v10 = vmul.f32 %v741_v4, %v365_v7 }
  0xc4   :  { %v299_v0 = vadd.f32 %v298_v62, %v289_v44 }
  0xc5   :  { %v367_v13 = vmul.f32 0.5, %v366_v10 }
  0xc6   :  { %v300_v2 = vrot.slane %v299_v0, 2 }
  0xc7   :  { %v368_v16 = vsub.f32 1.5, %v367_v13 }
  0xc8   :  { %v301_v5 = vadd.f32 %v300_v2, %v299_v0 }
  0xc9   :  { %v910_v45 = vld [vmem:[#allocation3] sm:$0xf]  ;;  %v369_v19 = vmul.f32 %v741_v4, %v368_v16 }
  0xca   :  { %v490_v46 = vsel %vm283_vm1, %v910_v45, 0.0  ;;  %v302_v8 = vrot.slane %v301_v5, 1 }
  0xcb   :  { %v492_v47 = vsel %vm48_vm0, %v490_v46, 0.0  ;;  %v370_v24 = vmul.f32 %v369_v19, %v362_v63 }
  0xcc   :  { %493 = vadd.xlane.f32.xlu1 %v492_v47  ;;  %v498_v1 = vrot.slane %v492_v47, 4  ;;  %v303_v11 = vadd.f32 %v302_v8, %v301_v5 }
  0xcd   :  { %v372_v28 = vsel %vm371_vm2, %v362_v63, %v370_v24 }
  0xce   :  { %v499_v3 = vadd.f32 %v498_v1, %v492_v47  ;;  %v921_v14 = vmax.f32 %v303_v11, 0.0  ;;  %v375_v34 = vsel %vm373_vm3, %v374_v27, %v372_v28 }
  0xcf   :  { %v929_v39 = vmax.f32 %v375_v34, 1e-12 }
  0xd0   :  { %v500_v6 = vrot.slane %v499_v3, 2  ;;  %742 = vrsqrt.f32 %v921_v14  ;;  %vm383_vm6 = vcmp.eq.f32.partialorder %v921_v14, inf  ;;  %v386_v1 = vand.u32 2147483648, %v921_v14 }
  0xd1   :  { %vm385_vm7 = vcmp.eq.f32.partialorder %v921_v14, 0.0  ;;  %vm395_vm8 = vweird.f32 %v929_v39  ;;  %v399_v11 = vand.u32 2147483647, %v929_v39 }
  0xd2   :  { %v501_v9 = vadd.f32 %v500_v6, %v499_v3 }
  0xd3   :  { %v247_v48 = vpop.f32.mrf.mxu2  ;;  %v267_v50 = vpop.f32.mrf.mxu3 }
  0xd4   :  { %v268_v51 = vadd.f32 %v267_v50, %v247_v48  ;;  %v502_v12 = vrot.slane %v501_v9, 1 }
  0xd6   :  { %v271_v52 = vadd.f32 %v268_v51, %v167_v49  ;;  %v503_v15 = vadd.f32 %v502_v12, %v501_v9  ;;  %v743_v22 = vpop.eup %742 }
  0xd7   :  { %v377_v25 = vmul.f32 %v743_v22, %v921_v14 }
  0xd8   :  { %273 = vst.msk [vmem:[#allocation3 + $0x4] sm:$0xf] %vm48_vm0, %v271_v52  ;;  %v924_v18 = vmax.f32 %v503_v15, 0.0 }
  0xd9   :  { %v378_v32 = vmul.f32 %v743_v22, %v377_v25  ;;  %v401_v25 = vand.u32 2147483648, %v929_v39 }
  0xda   :  { %744 = vrsqrt.f32 %v924_v18  ;;  %vm577_vm9 = vcmp.eq.f32.partialorder %v924_v18, inf  ;;  %vm579_vm14 = vcmp.eq.f32.partialorder %v924_v18, 0.0 }
  0xdb   :  { %v379_v40 = vmul.f32 0.5, %v378_v32 }
  0xdd   :  { %v380_v47 = vsub.f32 1.5, %v379_v40  ;;  %v402_v40 = vor.u32 1.1754944e-38, %v401_v25 }
  0xdf   :  { %v916_v53 = vld [vmem:[#allocation3 + $0x4] sm:$0xf] }
  0xe0   :  { %v491_v54 = vsel %vm283_vm1, %v916_v53, 0.0  ;;  %v745_v30 = vpop.eup %744  ;;  %vm981_vm1 = vcmp.eq.f32.partialorder %v399_v11, 8.507059e+37 }
  0xe1   :  { %v495_v55 = vsel %vm48_vm0, %v491_v54, 0.0  ;;  %v571_v35 = vmul.f32 %v745_v30, %v924_v18  ;;  %v381_v54 = vmul.f32 %v743_v22, %v380_v47 }
  0xe2   :  { %496 = vadd.xlane.f32.xlu1 %v495_v55  ;;  %v504_v17 = vrot.slane %v495_v55, 4 }
  0xe3   :  { %v572_v43 = vmul.f32 %v745_v30, %v571_v35  ;;  %v382_v62 = vmul.f32 %v381_v54, %v921_v14 }
  0xe4   :  { %v505_v20 = vadd.f32 %v504_v17, %v495_v55 }
  0xe5   :  { %v573_v49 = vmul.f32 0.5, %v572_v43  ;;  %v384_v2 = vsel %vm383_vm6, %v921_v14, %v382_v62 }
  0xe6   :  { %v506_v26 = vrot.slane %v505_v20, 2  ;;  %v387_v7 = vsel %vm385_vm7, %v386_v1, %v384_v2 }
  0xe7   :  { %v574_v58 = vsub.f32 1.5, %v573_v49  ;;  %v958_v16 = vmax.f32 %v387_v7, 1e-12 }
  0xe8   :  { %v507_v31 = vadd.f32 %v506_v26, %v505_v20  ;;  %v580_v26 = vand.u32 2147483648, %v924_v18 }
  0xe9   :  { %v575_v0 = vmul.f32 %v745_v30, %v574_v58  ;;  %v414_v30 = vand.u32 2147483647, %v958_v16 }
  0xea   :  { %v508_v37 = vrot.slane %v507_v31, 1 }
  0xeb   :  { %v576_v5 = vmul.f32 %v575_v0, %v924_v18 }
  0xec   :  { %v509_v44 = vadd.f32 %v508_v37, %v507_v31 }
  0xed   :  { %v578_v17 = vsel %vm577_vm9, %v924_v18, %v576_v5 }
  0xee   :  { %v932_v51 = vmax.f32 %v509_v44, 0.0  ;;  %v581_v34 = vsel %vm579_vm14, %v580_v26, %v578_v17 }
  0xef   :  { %v996_v47 = vmax.f32 %v581_v34, 1e-12 }
  0xf0   :  { %v592_v26 = vand.u32 2147483648, %v932_v51 }
 0x11f   :  { %v288_v21 = vpop.xlane.xlu0 %287 }
 0x120   :  { %v304_v23 = vmax.f32 %v288_v21, 0.0 }
 0x122   :  { %746 = vrsqrt.f32 %v304_v23  ;;  %vm313_vm4 = vcmp.eq.f32.partialorder %v304_v23, inf  ;;  %v316_v50 = vand.u32 2147483648, %v304_v23  ;;  %vm315_vm5 = vcmp.eq.f32.partialorder %v304_v23, 0.0 }
 0x123   :  { %748 = vrcp.f32 %v929_v39 }
 0x124   :  { %750 = vrsqrt.f32 %v932_v51 }
 0x128   :  { %v747_v33 = vpop.eup %746 }
 0x129   :  { %v307_v36 = vmul.f32 %v747_v33, %v304_v23  ;;  %v934_v55 = vpop.eup %748 }
 0x12a   :  { %v391_v63 = vmul.f32 %v934_v55, %v929_v39  ;;  %v947_v4 = vpop.eup %750  ;;  %vm396_vm10 = vweird.f32 %v934_v55 }
 0x12b   :  { %v308_v38 = vmul.f32 %v747_v33, %v307_v36  ;;  %v583_v19 = vmul.f32 %v947_v4, %v932_v51  ;;  %vm971_vm13 = vmor %vm395_vm8, %vm396_vm10  ;;  %vm589_vm8 = vcmp.eq.f32.partialorder %v932_v51, inf  ;;  %vm410_vm10 = vweird.f32 %v958_v16 }
 0x12c   :  { %v392_v3 = vsub.f32 1.0, %v391_v63 }
 0x12d   :  { %v309_v42 = vmul.f32 0.5, %v308_v38  ;;  %v584_v37 = vmul.f32 %v947_v4, %v583_v19 }
 0x12e   :  { %v393_v14 = vmul.f32 %v934_v55, %v392_v3 }
 0x12f   :  { %v310_v46 = vsub.f32 1.5, %v309_v42  ;;  %v585_v54 = vmul.f32 0.5, %v584_v37 }
 0x130   :  { %v394_v24 = vadd.f32 %v934_v55, %v393_v14 }
 0x131   :  { %v311_v48 = vmul.f32 %v747_v33, %v310_v46 }
 0x132   :  { %v398_v39 = vsel %vm971_vm13, %v934_v55, %v394_v24  ;;  %v416_v24 = vand.u32 2147483648, %v958_v16  ;;  %vm591_vm13 = vcmp.eq.f32.partialorder %v932_v51, 0.0 }
 0x133   :  { %v312_v52 = vmul.f32 %v311_v48, %v304_v23  ;;  %v403_v55 = vsel %vm981_vm1, %v402_v40, %v398_v39  ;;  %vm415_vm1 = vcmp.eq.f32.partialorder %v414_v30, 8.507059e+37 }
 0x135   :  { %v291_v56 = vpop.xlane.xlu0 %290  ;;  %v314_v57 = vsel %vm313_vm4, %v304_v23, %v312_v52 }
 0x136   :  { %v936_v59 = vmax.f32 %v291_v56, 0.0  ;;  %v317_v60 = vsel %vm315_vm5, %v316_v50, %v314_v57 }
 0x137   :  { %v330_v61 = vmax.f32 %v317_v60, 1e-12 }
 0x138   :  { %752 = vrsqrt.f32 %v936_v59  ;;  %vm325_vm3 = vcmp.eq.f32.partialorder %v936_v59, inf  ;;  %v328_v18 = vand.u32 2147483648, %v936_v59  ;;  %vm327_vm4 = vcmp.eq.f32.partialorder %v936_v59, 0.0 }
 0x139   :  { %754 = vrcp.f32 %v330_v61  ;;  %vm337_vm11 = vweird.f32 %v330_v61  ;;  %v343_v20 = vand.u32 2147483648, %v330_v61  ;;  %v341_v23 = vand.u32 2147483647, %v330_v61 }
 0x13b   :  { %v344_v32 = vor.u32 1.1754944e-38, %v343_v20  ;;  %vm342_vm2 = vcmp.eq.f32.partialorder %v341_v23, 8.507059e+37 }
 0x13e   :  { %v753_v6 = vpop.eup %752 }
 0x13f   :  { %v755_v8 = vpop.eup %754  ;;  %v319_v9 = vmul.f32 %v753_v6, %v936_v59  ;;  %v494_v10 = vpop.xlane.xlu1 %493 }
 0x140   :  { %v953_v12 = vmax.f32 %v494_v10, 0.0  ;;  %v333_v13 = vmul.f32 %v755_v8, %v330_v61  ;;  %vm338_vm12 = vweird.f32 %v755_v8 }
 0x141   :  { %v320_v15 = vmul.f32 %v753_v6, %v319_v9  ;;  %vm977_vm15 = vmor %vm337_vm11, %vm338_vm12 }
 0x142   :  { %756 = vrsqrt.f32 %v953_v12  ;;  %v334_v22 = vsub.f32 1.0, %v333_v13  ;;  %vm519_vm5 = vcmp.eq.f32.partialorder %v953_v12, inf  ;;  %vm521_vm6 = vcmp.eq.f32.partialorder %v953_v12, 0.0 }
 0x143   :  { %v321_v21 = vmul.f32 0.5, %v320_v15  ;;  %758 = vrcp.f32 %v958_v16 }
 0x144   :  { %v335_v28 = vmul.f32 %v755_v8, %v334_v22  ;;  %760 = vrcp.f32 %v996_v47 }
 0x145   :  { %v322_v27 = vsub.f32 1.5, %v321_v21 }
 0x146   :  { %v336_v36 = vadd.f32 %v755_v8, %v335_v28 }
 0x147   :  { %v323_v35 = vmul.f32 %v753_v6, %v322_v27  ;;  %v522_v6 = vand.u32 2147483648, %v953_v12 }
 0x148   :  { %v757_v38 = vpop.eup %756  ;;  %v340_v44 = vsel %vm977_vm15, %v755_v8, %v336_v36 }
 0x149   :  { %v324_v42 = vmul.f32 %v323_v35, %v936_v59  ;;  %v513_v43 = vmul.f32 %v757_v38, %v953_v12  ;;  %v345_v46 = vsel %vm342_vm2, %v344_v32, %v340_v44  ;;  %v998_v48 = vpop.eup %758  ;;  %vm601_vm2 = vweird.f32 %v996_v47 }
 0x14a   :  { %v420_v52 = vmul.f32 %v345_v46, %v898_v29  ;;  %v406_v61 = vmul.f32 %v998_v48, %v958_v16  ;;  %v586_v29 = vsub.f32 1.5, %v585_v54  ;;  %v1014_v5 = vpop.eup %760  ;;  %vm411_vm7 = vweird.f32 %v998_v48 }
 0x14b   :  { %v326_v49 = vsel %vm325_vm3, %v936_v59, %v324_v42  ;;  %v514_v50 = vmul.f32 %v757_v38, %v513_v43  ;;  %v597_v17 = vmul.f32 %v1014_v5, %v996_v47  ;;  %vm1037_vm12 = vmor %vm410_vm10, %vm411_vm7  ;;  %vm602_vm3 = vweird.f32 %v1014_v5 }
 0x14c   :  { %v329_v56 = vsel %vm327_vm4, %v328_v18, %v326_v49  ;;  %v1004_v58 = vmul.f32 %v420_v52, %v403_v55  ;;  %v407_v1 = vsub.f32 1.0, %v406_v61  ;;  %v587_v3 = vmul.f32 %v947_v4, %v586_v29 }
 0x14d   :  { %v515_v57 = vmul.f32 0.5, %v514_v50  ;;  %v331_v60 = vmax.f32 %v329_v56, 1e-12  ;;  %v598_v25 = vsub.f32 1.0, %v597_v17  ;;  %v417_v18 = vor.u32 1.1754944e-38, %v416_v24 }
 0x14e   :  { %v424_v59 = vmul.f32 %v1004_v58, %v1004_v58  ;;  %v408_v13 = vmul.f32 %v998_v48, %v407_v1  ;;  %v588_v4 = vmul.f32 %v587_v3, %v932_v51  ;;  %v607_v56 = vand.u32 2147483648, %v996_v47 }
 0x14f   :  { %v516_v62 = vsub.f32 1.5, %v515_v57  ;;  %762 = vrcp.f32 %v331_v60  ;;  %v356_v22 = vand.u32 2147483647, %v331_v60  ;;  %vm352_vm11 = vweird.f32 %v331_v60 }
 0x150   :  { %v426_v0 = vsel %vm48_vm0, %v424_v59, 0.0  ;;  %v409_v20 = vadd.f32 %v998_v48, %v408_v13  ;;  %v590_v23 = vsel %vm589_vm8, %v932_v51, %v588_v4  ;;  %v599_v16 = vmul.f32 %v1014_v5, %v598_v25 }
 0x151   :  { %v517_v63 = vmul.f32 %v757_v38, %v516_v62  ;;  %427 = vadd.xlane.f32.xlu2 %v426_v0  ;;  %v593_v33 = vsel %vm591_vm13, %v592_v26, %v590_v23  ;;  %vm357_vm15 = vcmp.eq.f32.partialorder %v356_v22, 8.507059e+37  ;;  %v605_v61 = vand.u32 2147483647, %v996_v47 }
 0x152   :  { %v413_v37 = vsel %vm1037_vm12, %v998_v48, %v409_v20  ;;  %v1050_v42 = vmax.f32 %v593_v33, 1e-12  ;;  %v600_v54 = vadd.f32 %v1014_v5, %v599_v16  ;;  %v608_v3 = vor.u32 1.1754944e-38, %v607_v56 }
 0x153   :  { %v518_v2 = vmul.f32 %v517_v63, %v953_v12  ;;  %v418_v43 = vsel %vm415_vm1, %v417_v18, %v413_v37  ;;  %vm606_vm10 = vcmp.eq.f32.partialorder %v605_v61, 8.507059e+37 }
 0x154   :  { %v622_v24 = vand.u32 2147483648, %v1050_v42  ;;  %v620_v26 = vand.u32 2147483647, %v1050_v42 }
 0x155   :  { %v763_v7 = vpop.eup %762  ;;  %v520_v8 = vsel %vm519_vm5, %v953_v12, %v518_v2  ;;  %v497_v9 = vpop.xlane.xlu1 %496  ;;  %v358_v12 = vand.u32 2147483648, %v331_v60 }
 0x156   :  { %v1020_v10 = vmax.f32 %v497_v9, 0.0  ;;  %v348_v11 = vmul.f32 %v763_v7, %v331_v60  ;;  %v523_v14 = vsel %vm521_vm6, %v522_v6, %v520_v8  ;;  %vm353_vm9 = vweird.f32 %v763_v7  ;;  %vm1066_vm6 = vmor %vm601_vm2, %vm602_vm3 }
 0x157   :  { %v1023_v15 = vmax.f32 %v523_v14, 1e-12  ;;  %vm354_vm14 = vmor %vm352_vm11, %vm353_vm9  ;;  %v359_v32 = vor.u32 1.1754944e-38, %v358_v12  ;;  %v604_v0 = vsel %vm1066_vm6, %v1014_v5, %v600_v54 }
 0x158   :  { %764 = vrsqrt.f32 %v1020_v10  ;;  %v349_v19 = vsub.f32 1.0, %v348_v11  ;;  %vm531_vm9 = vcmp.eq.f32.partialorder %v1020_v10, inf  ;;  %v534_v47 = vand.u32 2147483648, %v1020_v10 }
 0x159   :  { %766 = vrcp.f32 %v1023_v15  ;;  %v549_v48 = vand.u32 2147483648, %v1023_v15  ;;  %v547_v52 = vand.u32 2147483647, %v1023_v15  ;;  %vm543_vm5 = vweird.f32 %v1023_v15 }
 0x15a   :  { %v350_v21 = vmul.f32 %v763_v7, %v349_v19  ;;  %768 = vrcp.f32 %v1050_v42  ;;  %vm533_vm11 = vcmp.eq.f32.partialorder %v1020_v10, 0.0  ;;  %v609_v9 = vsel %vm606_vm10, %v608_v3, %v604_v0 }
 0x15b   :  { %v550_v29 = vor.u32 1.1754944e-38, %v549_v48  ;;  %vm548_vm8 = vcmp.eq.f32.partialorder %v547_v52, 8.507059e+37 }
 0x15c   :  { %v351_v27 = vadd.f32 %v763_v7, %v350_v21 }
 0x15e   :  { %v765_v31 = vpop.eup %764  ;;  %v355_v36 = vsel %vm354_vm14, %v763_v7, %v351_v27  ;;  %vm616_vm14 = vweird.f32 %v1050_v42 }
 0x15f   :  { %v767_v34 = vpop.eup %766  ;;  %v525_v35 = vmul.f32 %v765_v31, %v1020_v10  ;;  %v360_v38 = vsel %vm357_vm15, %v359_v32, %v355_v36  ;;  %v623_v32 = vor.u32 1.1754944e-38, %v622_v24 }
 0x160   :  { %v539_v39 = vmul.f32 %v767_v34, %v1023_v15  ;;  %v421_v40 = vmul.f32 %v360_v38, %v904_v41  ;;  %vm544_vm4 = vweird.f32 %v767_v34  ;;  %v769_v7 = vpop.eup %768 }
 0x161   :  { %v526_v51 = vmul.f32 %v765_v31, %v525_v35  ;;  %vm545_vm7 = vmor %vm543_vm5, %vm544_vm4  ;;  %v612_v15 = vmul.f32 %v769_v7, %v1050_v42  ;;  %vm617_vm12 = vweird.f32 %v769_v7  ;;  %vm621_vm4 = vcmp.eq.f32.partialorder %v620_v26, 8.507059e+37 }
 0x162   :  { %v540_v44 = vsub.f32 1.0, %v539_v39  ;;  %v1053_v49 = vmul.f32 %v421_v40, %v418_v43  ;;  %vm618_vm1 = vmor %vm616_vm14, %vm617_vm12 }
 0x163   :  { %v527_v46 = vmul.f32 0.5, %v526_v51 }
 0x164   :  { %v541_v50 = vmul.f32 %v767_v34, %v540_v44  ;;  %v425_v55 = vmul.f32 %v1053_v49, %v1053_v49 }
 0x165   :  { %v528_v41 = vsub.f32 1.5, %v527_v46 }
 0x166   :  { %v542_v57 = vadd.f32 %v767_v34, %v541_v50  ;;  %v429_v59 = vsel %vm48_vm0, %v425_v55, 0.0 }
 0x167   :  { %v529_v62 = vmul.f32 %v765_v31, %v528_v41  ;;  %430 = vadd.xlane.f32.xlu2 %v429_v59 }
 0x168   :  { %v546_v63 = vsel %vm545_vm7, %v767_v34, %v542_v57 }
 0x169   :  { %v530_v1 = vmul.f32 %v529_v62, %v1020_v10  ;;  %v551_v2 = vsel %vm548_vm8, %v550_v29, %v546_v63 }
 0x16a   :  { %v626_v6 = vmul.f32 %v551_v2, %v910_v45  ;;  %v613_v45 = vsub.f32 1.0, %v612_v15 }
 0x16b   :  { %v532_v8 = vsel %vm531_vm9, %v1020_v10, %v530_v1 }
 0x16c   :  { %v1081_v11 = vmul.f32 %v626_v6, %v609_v9  ;;  %v535_v5 = vsel %vm533_vm11, %v534_v47, %v532_v8  ;;  %v614_v12 = vmul.f32 %v769_v7, %v613_v45 }
 0x16d   :  { %v537_v13 = vmax.f32 %v535_v5, 1e-12 }
 0x16e   :  { %v630_v14 = vmul.f32 %v1081_v11, %v1081_v11  ;;  %v615_v23 = vadd.f32 %v769_v7, %v614_v12 }
 0x16f   :  { %770 = vrcp.f32 %v537_v13  ;;  %v564_v10 = vand.u32 2147483648, %v537_v13  ;;  %v562_v22 = vand.u32 2147483647, %v537_v13  ;;  %vm558_vm15 = vweird.f32 %v537_v13 }
 0x170   :  { %v632_v4 = vsel %vm48_vm0, %v630_v14, 0.0  ;;  %v619_v30 = vsel %vm618_vm1, %v769_v7, %v615_v23 }
 0x171   :  { %633 = vadd.xlane.f32.xlu0 %v632_v4  ;;  %v565_v27 = vor.u32 1.1754944e-38, %v564_v10  ;;  %vm563_vm3 = vcmp.eq.f32.partialorder %v562_v22, 8.507059e+37  ;;  %v624_v34 = vsel %vm621_vm4, %v623_v32, %v619_v30 }
 0x175   :  { %v771_v17 = vpop.eup %770 }
 0x176   :  { %v554_v19 = vmul.f32 %v771_v17, %v537_v13  ;;  %vm559_vm13 = vweird.f32 %v771_v17 }
 0x177   :  { %vm560_vm2 = vmor %vm558_vm15, %vm559_vm13 }
 0x178   :  { %v555_v20 = vsub.f32 1.0, %v554_v19 }
 0x17a   :  { %v556_v21 = vmul.f32 %v771_v17, %v555_v20 }
 0x17c   :  { %v557_v25 = vadd.f32 %v771_v17, %v556_v21 }
 0x17e   :  { %v561_v28 = vsel %vm560_vm2, %v771_v17, %v557_v25 }
 0x17f   :  { %v566_v31 = vsel %vm563_vm3, %v565_v27, %v561_v28 }
 0x180   :  { %v627_v33 = vmul.f32 %v566_v31, %v916_v53 }
 0x182   :  { %v1091_v35 = vmul.f32 %v627_v33, %v624_v34 }
 0x184   :  { %v631_v36 = vmul.f32 %v1091_v35, %v1091_v35 }
 0x186   :  { %v635_v37 = vsel %vm48_vm0, %v631_v36, 0.0 }
 0x187   :  { %636 = vadd.xlane.f32.xlu1 %v635_v37 }
 0x1c4   :  { %v428_v38 = vpop.xlane.xlu2 %427 }
 0x1c5   :  { %772 = vrsqrt.f32 %v428_v38  ;;  %vm439_vm5 = vcmp.eq.f32.partialorder %v428_v38, inf  ;;  %v442_v0 = vand.u32 2147483648, %v428_v38  ;;  %vm441_vm7 = vcmp.eq.f32.partialorder %v428_v38, 0.0 }
 0x1cb   :  { %v773_v18 = vpop.eup %772 }
 0x1cc   :  { %v433_v16 = vmul.f32 %v773_v18, %v428_v38 }
 0x1ce   :  { %v434_v40 = vmul.f32 %v773_v18, %v433_v16 }
 0x1d0   :  { %v435_v44 = vmul.f32 0.5, %v434_v40 }
 0x1d2   :  { %v436_v48 = vsub.f32 1.5, %v435_v44 }
 0x1d4   :  { %v437_v41 = vmul.f32 %v773_v18, %v436_v48 }
 0x1d6   :  { %v438_v60 = vmul.f32 %v437_v41, %v428_v38 }
 0x1d8   :  { %v440_v29 = vsel %vm439_vm5, %v428_v38, %v438_v60 }
 0x1d9   :  { %v443_v3 = vsel %vm441_vm7, %v442_v0, %v440_v29 }
 0x1da   :  { %v431_v39 = vpop.xlane.xlu2 %430  ;;  %v456_v5 = vmax.f32 %v443_v3, 1e-12 }
 0x1db   :  { %774 = vrsqrt.f32 %v431_v39  ;;  %vm451_vm8 = vcmp.eq.f32.partialorder %v431_v39, inf  ;;  %v454_v7 = vand.u32 2147483648, %v431_v39  ;;  %vm453_vm10 = vcmp.eq.f32.partialorder %v431_v39, 0.0 }
 0x1dc   :  { %vm463_vm2 = vweird.f32 %v456_v5 }
 0x1e1   :  { %v775_v51 = vpop.eup %774 }
 0x1e2   :  { %v445_v42 = vmul.f32 %v775_v51, %v431_v39 }
 0x1e4   :  { %v634_v43 = vpop.xlane.xlu0 %633  ;;  %v446_v53 = vmul.f32 %v775_v51, %v445_v42  ;;  %v467_v42 = vand.u32 2147483647, %v456_v5 }
 0x1e5   :  { %776 = vrsqrt.f32 %v634_v43  ;;  %vm645_vm6 = vcmp.eq.f32.partialorder %v634_v43, inf  ;;  %v648_v1 = vand.u32 2147483648, %v634_v43  ;;  %vm647_vm9 = vcmp.eq.f32.partialorder %v634_v43, 0.0 }
 0x1e6   :  { %v447_v46 = vmul.f32 0.5, %v446_v53  ;;  %vm468_vm7 = vcmp.eq.f32.partialorder %v467_v42, 8.507059e+37 }
 0x1e8   :  { %v448_v54 = vsub.f32 1.5, %v447_v46 }
 0x1ea   :  { %v449_v57 = vmul.f32 %v775_v51, %v448_v54  ;;  %v469_v51 = vand.u32 2147483648, %v456_v5 }
 0x1eb   :  { %v777_v50 = vpop.eup %776 }
 0x1ec   :  { %v639_v52 = vmul.f32 %v777_v50, %v634_v43  ;;  %v450_v59 = vmul.f32 %v449_v57, %v431_v39  ;;  %v470_v54 = vor.u32 1.1754944e-38, %v469_v51 }
 0x1ee   :  { %v640_v55 = vmul.f32 %v777_v50, %v639_v52  ;;  %v452_v47 = vsel %vm451_vm8, %v431_v39, %v450_v59 }
 0x1ef   :  { %v455_v13 = vsel %vm453_vm10, %v454_v7, %v452_v47 }
 0x1f0   :  { %v641_v56 = vmul.f32 0.5, %v640_v55  ;;  %v1096_v14 = vmax.f32 %v455_v13, 1e-12 }
 0x1f2   :  { %v642_v61 = vsub.f32 1.5, %v641_v56  ;;  %v484_v41 = vand.u32 2147483648, %v1096_v14  ;;  %v482_v57 = vand.u32 2147483647, %v1096_v14 }
 0x1f4   :  { %v643_v62 = vmul.f32 %v777_v50, %v642_v61  ;;  %vm483_vm10 = vcmp.eq.f32.partialorder %v482_v57, 8.507059e+37 }
 0x1f6   :  { %v644_v63 = vmul.f32 %v643_v62, %v634_v43 }
 0x1f8   :  { %v646_v2 = vsel %vm645_vm6, %v634_v43, %v644_v63  ;;  %vm478_vm6 = vweird.f32 %v1096_v14 }
 0x1f9   :  { %v649_v6 = vsel %vm647_vm9, %v648_v1, %v646_v2  ;;  %v485_v1 = vor.u32 1.1754944e-38, %v484_v41 }
 0x1fa   :  { %v662_v8 = vmax.f32 %v649_v6, 1e-12  ;;  %v637_v9 = vpop.xlane.xlu1 %636 }
 0x1fb   :  { %778 = vrsqrt.f32 %v637_v9  ;;  %vm657_vm11 = vcmp.eq.f32.partialorder %v637_v9, inf  ;;  %v660_v27 = vand.u32 2147483648, %v637_v9  ;;  %vm659_vm12 = vcmp.eq.f32.partialorder %v637_v9, 0.0 }
 0x1fc   :  { %780 = vrcp.f32 %v662_v8  ;;  %v675_v18 = vand.u32 2147483648, %v662_v8  ;;  %vm669_vm15 = vweird.f32 %v662_v8  ;;  %v673_v16 = vand.u32 2147483647, %v662_v8 }
 0x1fd   :  { %782 = vrcp.f32 %v456_v5 }
 0x1fe   :  { %784 = vrcp.f32 %v1096_v14  ;;  %v676_v48 = vor.u32 1.1754944e-38, %v675_v18  ;;  %vm674_vm5 = vcmp.eq.f32.partialorder %v673_v16, 8.507059e+37 }
 0x201   :  { %v779_v15 = vpop.eup %778 }
 0x202   :  { %v651_v4 = vmul.f32 %v779_v15, %v637_v9  ;;  %v781_v45 = vpop.eup %780 }
 0x203   :  { %v783_v19 = vpop.eup %782  ;;  %v665_v20 = vmul.f32 %v781_v45, %v662_v8  ;;  %vm670_vm13 = vweird.f32 %v781_v45 }
 0x204   :  { %v652_v17 = vmul.f32 %v779_v15, %v651_v4  ;;  %v785_v21 = vpop.eup %784  ;;  %v459_v22 = vmul.f32 %v783_v19, %v456_v5  ;;  %vm464_vm14 = vweird.f32 %v783_v19  ;;  %vm1100_vm1 = vmor %vm669_vm15, %vm670_vm13 }
 0x205   :  { %v666_v24 = vsub.f32 1.0, %v665_v20  ;;  %v474_v26 = vmul.f32 %v785_v21, %v1096_v14  ;;  %vm1106_vm3 = vmor %vm463_vm2, %vm464_vm14  ;;  %vm479_vm4 = vweird.f32 %v785_v21  ;;  %vm712_vm14 = vcmask 0  }
 0x206   :  { %v653_v12 = vmul.f32 0.5, %v652_v17  ;;  %v460_v28 = vsub.f32 1.0, %v459_v22  ;;  %vm1114_vm8 = vmor %vm478_vm6, %vm479_vm4 }
 0x207   :  { %v667_v32 = vmul.f32 %v781_v45, %v666_v24  ;;  %v475_v34 = vsub.f32 1.0, %v474_v26 }
 0x208   :  { %v654_v10 = vsub.f32 1.5, %v653_v12  ;;  %v461_v36 = vmul.f32 %v783_v19, %v460_v28 }
 0x209   :  { %v668_v37 = vadd.f32 %v781_v45, %v667_v32  ;;  %v476_v38 = vmul.f32 %v785_v21, %v475_v34 }
 0x20a   :  { %v655_v23 = vmul.f32 %v779_v15, %v654_v10  ;;  %v462_v39 = vadd.f32 %v783_v19, %v461_v36 }
 0x20b   :  { %v672_v43 = vsel %vm1100_vm1, %v781_v45, %v668_v37  ;;  %v477_v46 = vadd.f32 %v785_v21, %v476_v38 }
 0x20c   :  { %v656_v25 = vmul.f32 %v655_v23, %v637_v9  ;;  %v466_v50 = vsel %vm1106_vm3, %v783_v19, %v462_v39  ;;  %v677_v55 = vsel %vm674_vm5, %v676_v48, %v672_v43 }
 0x20d   :  { %v471_v61 = vsel %vm468_vm7, %v470_v54, %v466_v50  ;;  %v481_v62 = vsel %vm1114_vm8, %v785_v21, %v477_v46  ;;  %v678_v29 = vmul.f32 %v677_v55, %v1081_v11 }
 0x20e   :  { %v658_v30 = vsel %vm657_vm11, %v637_v9, %v656_v25  ;;  %v472_v2 = vmul.f32 %v471_v61, %v1004_v58  ;;  %v486_v47 = vsel %vm483_vm10, %v485_v1, %v481_v62 }
 0x20f   :  { %v661_v31 = vsel %vm659_vm12, %v660_v27, %v658_v30  ;;  %v487_v5 = vmul.f32 %v486_v47, %v1053_v49 }
 0x210   :  { %v663_v33 = vmax.f32 %v661_v31, 1e-12  ;;  %v694_v8 = vsub.f32 %v472_v2, %v678_v29 }
 0x212   :  { %786 = vrcp.f32 %v663_v33  ;;  %v690_v59 = vand.u32 2147483648, %v663_v33  ;;  %v688_v0 = vand.u32 2147483647, %v663_v33  ;;  %vm684_vm11 = vweird.f32 %v663_v33 }
 0x213   :  { %v696_v14 = vmul.f32 %v694_v8, %v694_v8 }
 0x214   :  { %v691_v6 = vor.u32 1.1754944e-38, %v690_v59  ;;  %vm689_vm13 = vcmp.eq.f32.partialorder %v688_v0, 8.507059e+37 }
 0x215   :  { %v698_v4 = vsel %vm48_vm0, %v696_v14, 0.0 }
 0x218   :  { %v787_v53 = vpop.eup %786 }
 0x219   :  { %v680_v52 = vmul.f32 %v787_v53, %v663_v33  ;;  %vm685_vm9 = vweird.f32 %v787_v53 }
 0x21a   :  { %vm686_vm12 = vmor %vm684_vm11, %vm685_vm9 }
 0x21b   :  { %v681_v60 = vsub.f32 1.0, %v680_v52 }
 0x21d   :  { %v682_v63 = vmul.f32 %v787_v53, %v681_v60 }
 0x21f   :  { %v683_v3 = vadd.f32 %v787_v53, %v682_v63 }
 0x221   :  { %v687_v7 = vsel %vm686_vm12, %v787_v53, %v683_v3 }
 0x222   :  { %v692_v9 = vsel %vm689_vm13, %v691_v6, %v687_v7 }
 0x223   :  { %v693_v11 = vmul.f32 %v692_v9, %v1091_v35 }
 0x225   :  { %v695_v13 = vsub.f32 %v487_v5, %v693_v11 }
 0x227   :  { %v697_v15 = vmul.f32 %v695_v13, %v695_v13 }
 0x229   :  { %v699_v58 = vsel %vm48_vm0, %v697_v15, 0.0 }
 0x22a   :  { %v700_v45 = vadd.f32 %v699_v58, %v698_v4 }
 0x22c   :  { %v701_v17 = vsel %vm48_vm0, %v700_v45, 0.0 }
 0x22d   :  { %702 = vadd.xlane.f32.xlu2 %v701_v17 }
 0x2a0   :  { %v703_v19 = vpop.xlane.xlu2 %702 }
 0x2a1   :  { %v704_v12 = vrot.slane %v703_v19, 4 }
 0x2a3   :  { %v705_v20 = vadd.f32 %v704_v12, %v703_v19 }
 0x2a5   :  { %v706_v10 = vrot.slane %v705_v20, 2 }
 0x2a7   :  { %v707_v21 = vadd.f32 %v706_v10, %v705_v20 }
 0x2a9   :  { %v708_v22 = vrot.slane %v707_v21, 1 }
 0x2ab   :  { %v709_v49 = vadd.f32 %v708_v22, %v707_v21 }
 0x2ad   :  { %732 = vpush %v709_v49 }
 0x2de   :  { %s733_s24 = spop %732 }
 0x2df   :  { %v711_v35 = vstv %s733_s24 }
 0x2e0   :  { %713 = vst.msk [vmem:[#allocation9] sm:$0x1] %vm712_vm14, %v711_v35 }
 0x2e1   :  { %724 = dma.vmem_to_hbm [thread:$0]  %s720_s23, 16, %s722_s21, [#allocation6]  }
 0x2e2   :  { %864 = dma.done.wait [#allocation6], 16  }
 0x2e3   :  { %865 = vsyncadd [#allocation6], 4294967280 }
 0x2e4   :  { %729 = vsyncpa [#allocation5], 1 }
 0x2e5   :  { %730 = vsyncpa [#allocation8], 1 }
 0x2e6   :  { %731 = vsyncpa [#allocation6], 1 }

</bundles_post_ra>
